<compile_context>
chip_gen: v6e
topology: v6e:2x2x1
jax: 0.10.0
libtpu: 0.0.40
codegen_flags: <defaults>
</compile_context>

<pallas_src>
import functools

import jax
import jax.numpy as jnp
from jax.experimental import pallas as pl
from jax.experimental.pallas import tpu as pltpu

LANE = 128
SUBLANE = 8


def _round_up(n: int, m: int) -> int:
    return -(-n // m) * m


# ----------------------------------------------------------------------------
# One-time parameter preparation (hoisted out of the per-call forward path).
# ----------------------------------------------------------------------------
def prepare_actor_params(params, weight_dtype=jnp.float32):
    """Zero-pad every weight/bias to 128-lane multiples and cast weights to
    `weight_dtype` (bf16 recommended on v5e/v6e/v7x: MXU-native, half the DMA
    and half the resident VMEM).  Biases stay f32 (tiny, added post-accum).

    params: tuple of (w, b) with w shaped (in, out) -- i.e. PyTorch Linear
    weights already transposed.  Returns (flat_arrays, dim_state, dim_action)
    where flat_arrays = (w0, b0, w1, b1, ...), all padded, ready for
    `actor_forward`.  Padding columns/rows are zero, so results are exact.
    """
    dim_state = params[0][0].shape[0]
    dim_action = params[-1][0].shape[1]
    flat = []
    for (w, b) in params:
        din, dout = w.shape
        dip, dop = _round_up(din, LANE), _round_up(dout, LANE)
        w_p = jnp.pad(w.astype(jnp.float32),
                      ((0, dip - din), (0, dop - dout))).astype(weight_dtype)
        b_p = jnp.pad(b.reshape(1, -1).astype(jnp.float32),
                      ((0, 0), (0, dop - dout)))
        flat.append(w_p)
        flat.append(b_p)
    return tuple(flat), dim_state, dim_action


# ----------------------------------------------------------------------------
# Fused MLP kernel.
# ----------------------------------------------------------------------------
def _make_actor_kernel(num_linear: int):
    """Refs: x, (w_i, b_i) * num_linear, out.  ReLU on all but the last layer,
    sigmoid on the last.  Weights arrive already in compute dtype (no per-step
    cast); accumulation and elementwise work are f32."""

    def kernel(x_ref, *refs):
        out_ref = refs[-1]
        h = x_ref[...]                                   # f32 activations
        for li in range(num_linear):
            w = refs[2 * li][...]                        # compute-dtype weight
            b = refs[2 * li + 1][...]                    # f32 bias (1, D)
            z = jnp.dot(h.astype(w.dtype), w,
                        preferred_element_type=jnp.float32) + b
            if li < num_linear - 1:
                h = jnp.maximum(z, 0.0)                  # ReLU (VPU, f32)
            else:
                # Sigmoid head: exp + approx reciprocal both land on the EUP.
                out_ref[...] = pl.reciprocal(1.0 + jnp.exp(-z), approx=True)

    return kernel


# ----------------------------------------------------------------------------
# Forward pass (padded / lane-dense output).
# ----------------------------------------------------------------------------
def _actor_forward_padded(x, flat_params, batch_tile):
    batch, dim_state = x.shape
    num_linear = len(flat_params) // 2
    ds_pad = flat_params[0].shape[0]          # padded dim_state
    da_pad = flat_params[-1].shape[1]         # padded dim_action
    widths = [ds_pad] + [flat_params[2 * i].shape[1] for i in range(num_linear)]

    # --- batch tiling: big tiles, few grid steps --------------------------
    if batch_tile is None:
        batch_tile = min(512, _round_up(batch, SUBLANE))
    batch_tile = _round_up(int(batch_tile), SUBLANE)
    batch_pad = _round_up(batch, batch_tile)
    grid_steps = batch_pad // batch_tile

    # --- pad activations only when needed (exact: padded entries are zero) -
    x_p = x.astype(jnp.float32)
    if batch_pad != batch or ds_pad != dim_state:
        x_p = jnp.pad(x_p, ((0, batch_pad - batch), (0, ds_pad - dim_state)))

    # --- specs: x/out walk the batch grid; weights/biases are whole-array ---
    # VMEM residents (fetched once, single-buffered).
    in_specs = [pl.BlockSpec((batch_tile, ds_pad), lambda i: (i, 0))]
    for _ in flat_params:
        in_specs.append(pl.BlockSpec(memory_space=pltpu.MemorySpace.VMEM))
    out_specs = pl.BlockSpec((batch_tile, da_pad), lambda i: (i, 0))

    # --- explicit VMEM budget (matters on v7x's 64 MiB) ---------------------
    weight_bytes = sum(int(p.size) * p.dtype.itemsize for p in flat_params)
    io_tile_bytes = 2 * batch_tile * (ds_pad + da_pad) * 4        # dbl-buffered
    act_bytes = num_linear * batch_tile * max(widths) * 4         # live h tiles
    vmem_limit = int(min(64 * 1024 * 1024,
                         max(32 * 1024 * 1024,
                             2 * (weight_bytes + io_tile_bytes + act_bytes))))

    # Megacore sharding only pays off with >=2 grid steps; otherwise it just
    # duplicates the resident-weight DMA on each TensorCore.
    semantics = ("parallel",) if grid_steps >= 2 else ("arbitrary",)

    # --- advisory cost estimate ---------------------------------------------
    flops = 2 * batch_pad * sum(
        int(flat_params[2 * i].shape[0] * flat_params[2 * i].shape[1])
        for i in range(num_linear))
    bytes_accessed = (4 * x_p.size + weight_bytes + 4 * batch_pad * da_pad)
    transcendentals = 2 * batch_pad * da_pad       # exp + approx reciprocal

    return pl.pallas_call(
        _make_actor_kernel(num_linear),
        out_shape=jax.ShapeDtypeStruct((batch_pad, da_pad), jnp.float32),
        grid=(grid_steps,),
        in_specs=in_specs,
        out_specs=out_specs,
        compiler_params=pltpu.CompilerParams(
            dimension_semantics=semantics,
            vmem_limit_bytes=vmem_limit),
        cost_estimate=pl.CostEstimate(flops=flops,
                                      transcendentals=transcendentals,
                                      bytes_accessed=bytes_accessed),
    )(x_p, *flat_params)


# Padded / lane-dense output (preferred when the consumer tolerates padding).
actor_forward_padded = jax.jit(_actor_forward_padded,
                               static_argnames=("batch_tile",))


@functools.partial(jax.jit, static_argnames=("dim_action", "batch_tile"))
def actor_forward(x, flat_params, dim_action, batch_tile=None):
    """Convenience wrapper returning the exact (batch, dim_action) result."""
    out_p = _actor_forward_padded(x, flat_params, batch_tile)
    return out_p[: x.shape[0], :dim_action]


# ----------------------------------------------------------------------------
# Init / reference (mirror the PyTorch module).
# ----------------------------------------------------------------------------
def init_actor_params(key, dim_state, dim_action, num_layer, dim_layer,
                      init_w=0.003):
    """Shapes/init mirroring Actor.__init__ (weights already stored (in, out))."""
    sizes = ([(dim_state, dim_layer)]
             + [(dim_layer, dim_layer)] * num_layer
             + [(dim_layer, dim_action)])
    keys = jax.random.split(key, 2 * len(sizes))
    params = []
    for li, (din, dout) in enumerate(sizes):
        kw, kb = keys[2 * li], keys[2 * li + 1]
        if li < len(sizes) - 1:
            bound = 1.0 / float(din) ** 0.5          # fanin_init
            w = jax.random.uniform(kw, (din, dout), jnp.float32, -bound, bound)
        else:
            w = jax.random.uniform(kw, (din, dout), jnp.float32, -init_w, init_w)
        bbound = 1.0 / float(din) ** 0.5             # PyTorch Linear bias init
        b = jax.random.uniform(kb, (dout,), jnp.float32, -bbound, bbound)
        params.append((w, b))
    return tuple(params)


def actor_reference(x, params):
    """Plain-JAX reference mirroring the PyTorch forward."""
    h = x
    for w, b in params[:-1]:
        h = jax.nn.relu(h @ w + b)
    w, b = params[-1]
    return jax.nn.sigmoid(h @ w + b)


if __name__ == "__main__":
    # Small, module-consistent shapes (not 128-aligned, to exercise padding).
    batch = 32
    dim_state = 17
    dim_action = 6
    num_layer = 2
    dim_layer = 48

    key = jax.random.PRNGKey(0)
    kx, kp = jax.random.split(key)
    x = jax.random.normal(kx, (batch, dim_state), jnp.float32)
    params = init_actor_params(kp, dim_state, dim_action, num_layer, dim_layer)
    ref = actor_reference(x, params)

    # f32 weights, one-time prepared (padding/casting hoisted out of forward).
    flat_f32, _, _ = prepare_actor_params(params, weight_dtype=jnp.float32)
    out = jax.block_until_ready(actor_forward(x, flat_f32, dim_action))
    assert out.shape == (batch, dim_action)
    # approx-reciprocal sigmoid head => small relative-error budget
    assert jnp.allclose(out, ref, atol=5e-3, rtol=5e-3), (out, ref)

    # Multi-step batch grid coverage (parallel batch axis).
    out_g = jax.block_until_ready(
        actor_forward(x, flat_f32, dim_action, batch_tile=16))
    assert jnp.allclose(out_g, ref, atol=5e-3, rtol=5e-3)

    # bf16 resident weights (half the DMA / resident VMEM), f32 accumulation.
    flat_bf16, _, _ = prepare_actor_params(params, weight_dtype=jnp.bfloat16)
    out_bf16 = jax.block_until_ready(actor_forward(x, flat_bf16, dim_action))
    assert out_bf16.shape == (batch, dim_action)
    assert jnp.allclose(out_bf16, ref, atol=5e-2, rtol=5e-2)

    # Padded / lane-dense output path (no post-kernel slice copy).
    out_p = jax.block_until_ready(actor_forward_padded(x, flat_f32, None))
    assert jnp.allclose(out_p[:batch, :dim_action], ref, atol=5e-3, rtol=5e-3)

    print("KERNEL_OK")
</pallas_src>

<mosaic_0001>
module attributes {stable_mosaic.version = 11 : i64} {
  func.func @kernel(%arg0: i32, %arg1: memref<32x128xf32, #tpu.memory_space<vmem>>, %arg2: memref<128x128xf32, #tpu.memory_space<vmem>>, %arg3: memref<1x128xf32, #tpu.memory_space<vmem>>, %arg4: memref<128x128xf32, #tpu.memory_space<vmem>>, %arg5: memref<1x128xf32, #tpu.memory_space<vmem>>, %arg6: memref<128x128xf32, #tpu.memory_space<vmem>>, %arg7: memref<1x128xf32, #tpu.memory_space<vmem>>, %arg8: memref<128x128xf32, #tpu.memory_space<vmem>>, %arg9: memref<1x128xf32, #tpu.memory_space<vmem>>, %arg10: memref<32x128xf32, #tpu.memory_space<vmem>>) attributes {dimension_semantics = [#tpu.dimension_semantics<arbitrary>], iteration_bounds = array<i64: 1>, scalar_prefetch = 0 : i64, scratch_operands = 0 : i64, tpu.core_type = #tpu.core_type<tc>, window_params = [{transform_indices = @transform_0, window_bounds = array<i64: 32, 128>}, {pipeline_mode = #tpu.pipeline_mode<synchronous>, transform_indices = @transform_1, window_bounds = array<i64: 128, 128>}, {pipeline_mode = #tpu.pipeline_mode<synchronous>, transform_indices = @transform_2, window_bounds = array<i64: 1, 128>}, {pipeline_mode = #tpu.pipeline_mode<synchronous>, transform_indices = @transform_3, window_bounds = array<i64: 128, 128>}, {pipeline_mode = #tpu.pipeline_mode<synchronous>, transform_indices = @transform_4, window_bounds = array<i64: 1, 128>}, {pipeline_mode = #tpu.pipeline_mode<synchronous>, transform_indices = @transform_5, window_bounds = array<i64: 128, 128>}, {pipeline_mode = #tpu.pipeline_mode<synchronous>, transform_indices = @transform_6, window_bounds = array<i64: 1, 128>}, {pipeline_mode = #tpu.pipeline_mode<synchronous>, transform_indices = @transform_7, window_bounds = array<i64: 128, 128>}, {pipeline_mode = #tpu.pipeline_mode<synchronous>, transform_indices = @transform_8, window_bounds = array<i64: 1, 128>}, {transform_indices = @transform_9, window_bounds = array<i64: 32, 128>}]} {
    %c0 = arith.constant 0 : index
    %c0_0 = arith.constant 0 : index
    %0 = vector.load %arg1[%c0, %c0_0] : memref<32x128xf32, #tpu.memory_space<vmem>>, vector<32x128xf32>
    %c0_1 = arith.constant 0 : index
    %c0_2 = arith.constant 0 : index
    %1 = vector.load %arg2[%c0_1, %c0_2] : memref<128x128xf32, #tpu.memory_space<vmem>>, vector<128x128xf32>
    %c0_3 = arith.constant 0 : index
    %c0_4 = arith.constant 0 : index
    %2 = vector.load %arg3[%c0_3, %c0_4] : memref<1x128xf32, #tpu.memory_space<vmem>>, vector<1x128xf32>
    %cst = arith.constant dense<0.000000e+00> : vector<32x128xf32>
    %3 = tpu.matmul %0, %1, %cst {dimension_numbers = #tpu.dot_dimension_numbers<[1], [0], [0], [1], [0, 0, 1, 1], [], []>} : vector<32x128xf32>, vector<128x128xf32>, vector<32x128xf32> -> vector<32x128xf32>
    %4 = vector.broadcast %2 : vector<1x128xf32> to vector<32x128xf32>
    %5 = arith.addf %3, %4 : vector<32x128xf32>
    %cst_5 = arith.constant 0.000000e+00 : f32
    %6 = vector.broadcast %cst_5 : f32 to vector<32x128xf32>
    %7 = arith.maximumf %5, %6 : vector<32x128xf32>
    %c0_6 = arith.constant 0 : index
    %c0_7 = arith.constant 0 : index
    %8 = vector.load %arg4[%c0_6, %c0_7] : memref<128x128xf32, #tpu.memory_space<vmem>>, vector<128x128xf32>
    %c0_8 = arith.constant 0 : index
    %c0_9 = arith.constant 0 : index
    %9 = vector.load %arg5[%c0_8, %c0_9] : memref<1x128xf32, #tpu.memory_space<vmem>>, vector<1x128xf32>
    %cst_10 = arith.constant dense<0.000000e+00> : vector<32x128xf32>
    %10 = tpu.matmul %7, %8, %cst_10 {dimension_numbers = #tpu.dot_dimension_numbers<[1], [0], [0], [1], [0, 0, 1, 1], [], []>} : vector<32x128xf32>, vector<128x128xf32>, vector<32x128xf32> -> vector<32x128xf32>
    %11 = vector.broadcast %9 : vector<1x128xf32> to vector<32x128xf32>
    %12 = arith.addf %10, %11 : vector<32x128xf32>
    %cst_11 = arith.constant 0.000000e+00 : f32
    %13 = vector.broadcast %cst_11 : f32 to vector<32x128xf32>
    %14 = arith.maximumf %12, %13 : vector<32x128xf32>
    %c0_12 = arith.constant 0 : index
    %c0_13 = arith.constant 0 : index
    %15 = vector.load %arg6[%c0_12, %c0_13] : memref<128x128xf32, #tpu.memory_space<vmem>>, vector<128x128xf32>
    %c0_14 = arith.constant 0 : index
    %c0_15 = arith.constant 0 : index
    %16 = vector.load %arg7[%c0_14, %c0_15] : memref<1x128xf32, #tpu.memory_space<vmem>>, vector<1x128xf32>
    %cst_16 = arith.constant dense<0.000000e+00> : vector<32x128xf32>
    %17 = tpu.matmul %14, %15, %cst_16 {dimension_numbers = #tpu.dot_dimension_numbers<[1], [0], [0], [1], [0, 0, 1, 1], [], []>} : vector<32x128xf32>, vector<128x128xf32>, vector<32x128xf32> -> vector<32x128xf32>
    %18 = vector.broadcast %16 : vector<1x128xf32> to vector<32x128xf32>
    %19 = arith.addf %17, %18 : vector<32x128xf32>
    %cst_17 = arith.constant 0.000000e+00 : f32
    %20 = vector.broadcast %cst_17 : f32 to vector<32x128xf32>
    %21 = arith.maximumf %19, %20 : vector<32x128xf32>
    %c0_18 = arith.constant 0 : index
    %c0_19 = arith.constant 0 : index
    %22 = vector.load %arg8[%c0_18, %c0_19] : memref<128x128xf32, #tpu.memory_space<vmem>>, vector<128x128xf32>
    %c0_20 = arith.constant 0 : index
    %c0_21 = arith.constant 0 : index
    %23 = vector.load %arg9[%c0_20, %c0_21] : memref<1x128xf32, #tpu.memory_space<vmem>>, vector<1x128xf32>
    %cst_22 = arith.constant dense<0.000000e+00> : vector<32x128xf32>
    %24 = tpu.matmul %21, %22, %cst_22 {dimension_numbers = #tpu.dot_dimension_numbers<[1], [0], [0], [1], [0, 0, 1, 1], [], []>} : vector<32x128xf32>, vector<128x128xf32>, vector<32x128xf32> -> vector<32x128xf32>
    %25 = vector.broadcast %23 : vector<1x128xf32> to vector<32x128xf32>
    %26 = arith.addf %24, %25 : vector<32x128xf32>
    %cst_23 = arith.constant 0.000000e+00 : f32
    %27 = vector.broadcast %cst_23 : f32 to vector<32x128xf32>
    %28 = arith.subf %27, %26 : vector<32x128xf32>
    %29 = math.exp %28 : vector<32x128xf32>
    %cst_24 = arith.constant 1.000000e+00 : f32
    %30 = vector.broadcast %cst_24 : f32 to vector<32x128xf32>
    %31 = arith.addf %30, %29 : vector<32x128xf32>
    %32 = tpu.reciprocal %31 {approx = true} : vector<32x128xf32> -> vector<32x128xf32>
    %c0_25 = arith.constant 0 : index
    %c0_26 = arith.constant 0 : index
    %33 = vector.load %arg10[%c0_25, %c0_26] : memref<32x128xf32, #tpu.memory_space<vmem>>, vector<32x128xf32>
    tpu.vector_store %arg10[%c0_25, %c0_26], %32 {strides = array<i32>} : memref<32x128xf32, #tpu.memory_space<vmem>>, vector<32x128xf32>,
    return
  }
  func.func @transform_0(%arg0: i32) -> (i32, i32) {
    %c0_i32 = arith.constant 0 : i32
    %c0_i32_0 = arith.constant 0 : i32
    return %arg0, %c0_i32 : i32, i32
  }
  func.func @transform_1(%arg0: i32) -> (i32, i32) {
    %c0_i32 = arith.constant 0 : i32
    %c0_i32_0 = arith.constant 0 : i32
    %c0_i32_1 = arith.constant 0 : i32
    return %c0_i32, %c0_i32_0 : i32, i32
  }
  func.func @transform_2(%arg0: i32) -> (i32, i32) {
    %c0_i32 = arith.constant 0 : i32
    %c0_i32_0 = arith.constant 0 : i32
    %c0_i32_1 = arith.constant 0 : i32
    return %c0_i32, %c0_i32_0 : i32, i32
  }
  func.func @transform_3(%arg0: i32) -> (i32, i32) {
    %c0_i32 = arith.constant 0 : i32
    %c0_i32_0 = arith.constant 0 : i32
    %c0_i32_1 = arith.constant 0 : i32
    return %c0_i32, %c0_i32_0 : i32, i32
  }
  func.func @transform_4(%arg0: i32) -> (i32, i32) {
    %c0_i32 = arith.constant 0 : i32
    %c0_i32_0 = arith.constant 0 : i32
    %c0_i32_1 = arith.constant 0 : i32
    return %c0_i32, %c0_i32_0 : i32, i32
  }
  func.func @transform_5(%arg0: i32) -> (i32, i32) {
    %c0_i32 = arith.constant 0 : i32
    %c0_i32_0 = arith.constant 0 : i32
    %c0_i32_1 = arith.constant 0 : i32
    return %c0_i32, %c0_i32_0 : i32, i32
  }
  func.func @transform_6(%arg0: i32) -> (i32, i32) {
    %c0_i32 = arith.constant 0 : i32
    %c0_i32_0 = arith.constant 0 : i32
    %c0_i32_1 = arith.constant 0 : i32
    return %c0_i32, %c0_i32_0 : i32, i32
  }
  func.func @transform_7(%arg0: i32) -> (i32, i32) {
    %c0_i32 = arith.constant 0 : i32
    %c0_i32_0 = arith.constant 0 : i32
    %c0_i32_1 = arith.constant 0 : i32
    return %c0_i32, %c0_i32_0 : i32, i32
  }
  func.func @transform_8(%arg0: i32) -> (i32, i32) {
    %c0_i32 = arith.constant 0 : i32
    %c0_i32_0 = arith.constant 0 : i32
    %c0_i32_1 = arith.constant 0 : i32
    return %c0_i32, %c0_i32_0 : i32, i32
  }
  func.func @transform_9(%arg0: i32) -> (i32, i32) {
    %c0_i32 = arith.constant 0 : i32
    %c0_i32_0 = arith.constant 0 : i32
    return %arg0, %c0_i32 : i32, i32
  }
}

</mosaic_0001>

<bundles_post_ra>
// kernel: actor_forward.1
= control target key start
LH: loop header
LB: loop body
LE: loop exit
PB: predicated region body
PF: predicated region fallthrough
CT: control target
= control target key end

     0   :  { %14 = vsyncpa [#allocation3], 0  ;;  %s1020_s0 = inlined_call_operand.vmem [shape: f32[32,128], index: 0, kind: input, shape index: {}]   ;;  %s1021_s1 = inlined_call_operand.hbm [shape: f32[128,128], index: 1, kind: input, shape index: {}]   ;;  %s1022_s2 = inlined_call_operand.vmem [shape: f32[1,128], index: 2, kind: input, shape index: {}]   ;;  %s1023_s3 = inlined_call_operand.hbm [shape: f32[128,128], index: 3, kind: input, shape index: {}]   ;;  %s1024_s4 = inlined_call_operand.vmem [shape: f32[1,128], index: 4, kind: input, shape index: {}]   ;;  %s1025_s5 = inlined_call_operand.vmem [shape: f32[128,128], index: 5, kind: input, shape index: {}]   ;;  %s1026_s6 = inlined_call_operand.vmem [shape: f32[1,128], index: 6, kind: input, shape index: {}]   ;;  %s1027_s7 = inlined_call_operand.hbm [shape: f32[128,128], index: 7, kind: input, shape index: {}]   ;;  %s1028_s8 = inlined_call_operand.vmem [shape: f32[1,128], index: 8, kind: input, shape index: {}]   ;;  %s1029_s9 = inlined_call_operand.vmem [shape: f32[32,128], index: 9, kind: output, shape index: {}]  }
   0x1   :  { %15 = vsyncpa [#allocation5], 0  ;;  %s872_s30 = smov [#allocation4]   ;;  %s873_s11 = smov [#allocation2]  }
   0x2   :  { %s37_s10 = sshll.u32 %s872_s30, 4  ;;  %s23_s12 = sshll.u32 %s873_s11, 4  ;;  %s38_s10 = int_to_ptr.vmem [resolvable:$true] %s37_s10  ;;  %s24_s12 = int_to_ptr.vmem [resolvable:$true] %s23_s12 }
   0x3   :  { %s816_s13 = scalar_lea.vmem %s38_s10, 2048  ;;  %p821_p1 = scmp.lt.s32.totalorder %s38_s10, %s38_s10 }
   0x4   :  { %p817_p0 = scmp.ne.s32.totalorder %s38_s10, %s816_s13  ;;  %p822_p2 = scmp.lt.s32.totalorder %s816_s13, %s816_s13 }
   0x6   :  { %p823_p3 = por %p822_p2, %p821_p1 }
   0x8   :  { %p824_p4 = pnand %p823_p3, %p817_p0 }
   0xa   :  { %827 = shalt.err (!%p824_p4)
}
   0xb   :  { %s874_s14 = smov 128   ;;  %s875_s15 = smov 8  }
   0xc   :  { %43 = dma.hbm_to_vmem [thread:$0]  %s1023_s3, 2048, %s38_s10, [#allocation5], %s874_s14, %s874_s14, %s875_s15  }
   0xd   :  { %s836_s18 = scalar_lea.vmem %s24_s12, 2048  ;;  %p841_p6 = scmp.lt.s32.totalorder %s24_s12, %s24_s12 }
   0xe   :  { %p837_p5 = scmp.ne.s32.totalorder %s24_s12, %s836_s18  ;;  %p842_p7 = scmp.lt.s32.totalorder %s836_s18, %s836_s18 }
  0x10   :  { %p843_p8 = por %p842_p7, %p841_p6 }
  0x12   :  { %p844_p9 = pnand %p843_p8, %p837_p5 }
  0x14   :  { %847 = shalt.err (!%p844_p9)
}
  0x15   :  { %29 = dma.hbm_to_vmem [thread:$0]  %s1021_s1, 2048, %s24_s12, [#allocation3], %s874_s14, %s874_s14, %s875_s15  }
  0x16   :  { %s876_s21 = smov [#allocation6]  }
  0x17   :  { %s55_s22 = sshll.u32 %s876_s21, 4  ;;  %s56_s22 = int_to_ptr.vmem [resolvable:$true] %s55_s22 }
  0x18   :  { %s856_s23 = scalar_lea.vmem %s56_s22, 2048  ;;  %p861_p11 = scmp.lt.s32.totalorder %s56_s22, %s56_s22 }
  0x19   :  { %p857_p10 = scmp.ne.s32.totalorder %s56_s22, %s856_s23  ;;  %p862_p12 = scmp.lt.s32.totalorder %s856_s23, %s856_s23 }
  0x1b   :  { %p863_p13 = por %p862_p12, %p861_p11 }
  0x1d   :  { %p864_p0 = pnand %p863_p13, %p857_p10 }
  0x1f   :  { %867 = shalt.err (!%p864_p0)
}
  0x20   :  { %61 = dma.hbm_to_vmem [thread:$0]  %s1027_s7, 2048, %s56_s22, [#allocation5], %s874_s14, %s874_s14, %s875_s15  }
  0x21   :  { %868 = dma.done.wait [#allocation3], 2048  }
  0x22   :  { %869 = vsyncadd [#allocation3], 4294965248 }
  0x23   :  { %870 = dma.done.wait [#allocation5], 4096  }
  0x24   :  { %871 = vsyncadd [#allocation5], 4294963200  ;;  %v92_v0 = vld [vmem:[#allocation2 + $0x78] sm:$0xff]  ;;  %v91_v1 = vld [vmem:[#allocation2 + $0x70] sm:$0xff] }
  0x25   :  { %635 = vmatprep.subr.mxu0 %v92_v0  ;;  %v90_v2 = vld [vmem:[#allocation2 + $0x68] sm:$0xff]  ;;  %v89_v3 = vld [vmem:[#allocation2 + $0x60] sm:$0xff]  ;;  %v88_v5 = vld [vmem:[#allocation2 + $0x58] sm:$0xff] }
  0x26   :  { %636 = vmatpush3.msra.mxu0 %v92_v0  ;;  %v73_v4 = vld [vmem:[%s1020_s0] sm:$0xff]  ;;  %v204_v6 = vld [vmem:[#allocation4 + $0x78] sm:$0xff]  ;;  %v203_v7 = vld [vmem:[#allocation4 + $0x70] sm:$0xff] }
  0x27   :  { %637 = vmatprep.subr.mxu0 %v91_v1  ;;  %667 = vmatprep.mubr.f32.mxu0 %v73_v4  ;;  %v87_v8 = vld [vmem:[#allocation2 + $0x50] sm:$0xff]  ;;  %v202_v9 = vld [vmem:[#allocation4 + $0x68] sm:$0xff]  ;;  %v201_v11 = vld [vmem:[#allocation4 + $0x60] sm:$0xff] }
  0x28   :  { %638 = vmatpush3.msra.mxu0 %v91_v1  ;;  %673 = vmatprep.subr.mxu1 %v204_v6  ;;  %v86_v10 = vld [vmem:[#allocation2 + $0x48] sm:$0xff]  ;;  %v85_v12 = vld [vmem:[#allocation2 + $0x40] sm:$0xff]  ;;  %v200_v13 = vld [vmem:[#allocation4 + $0x58] sm:$0xff] }
  0x29   :  { %639 = vmatprep.subr.mxu0 %v90_v2  ;;  %674 = vmatpush3.msra.mxu1 %v204_v6  ;;  %v84_v14 = vld [vmem:[#allocation2 + $0x38] sm:$0xff]  ;;  %v199_v15 = vld [vmem:[#allocation4 + $0x50] sm:$0xff]  ;;  %v198_v17 = vld [vmem:[#allocation4 + $0x48] sm:$0xff] }
  0x2a   :  { %640 = vmatpush3.msra.mxu0 %v90_v2  ;;  %675 = vmatprep.subr.mxu1 %v203_v7  ;;  %v83_v16 = vld [vmem:[#allocation2 + $0x30] sm:$0xff]  ;;  %v82_v18 = vld [vmem:[#allocation2 + $0x28] sm:$0xff]  ;;  %v197_v19 = vld [vmem:[#allocation4 + $0x40] sm:$0xff] }
  0x2b   :  { %641 = vmatprep.subr.mxu0 %v89_v3  ;;  %676 = vmatpush3.msra.mxu1 %v203_v7  ;;  %v81_v20 = vld [vmem:[#allocation2 + $0x20] sm:$0xff]  ;;  %v196_v21 = vld [vmem:[#allocation4 + $0x38] sm:$0xff]  ;;  %v195_v23 = vld [vmem:[#allocation4 + $0x30] sm:$0xff] }
  0x2c   :  { %642 = vmatpush3.msra.mxu0 %v89_v3  ;;  %677 = vmatprep.subr.mxu1 %v202_v9  ;;  %v80_v22 = vld [vmem:[#allocation2 + $0x18] sm:$0xff]  ;;  %v79_v24 = vld [vmem:[#allocation2 + $0x10] sm:$0xff]  ;;  %v194_v25 = vld [vmem:[#allocation4 + $0x28] sm:$0xff] }
  0x2d   :  { %643 = vmatprep.subr.mxu0 %v88_v5  ;;  %678 = vmatpush3.msra.mxu1 %v202_v9  ;;  %v78_v26 = vld [vmem:[#allocation2 + $0x8] sm:$0xff]  ;;  %v193_v27 = vld [vmem:[#allocation4 + $0x20] sm:$0xff]  ;;  %v75_v30 = vld [vmem:[%s1020_s0 + $0x10] sm:$0xff] }
  0x2e   :  { %644 = vmatpush3.msra.mxu0 %v88_v5  ;;  %679 = vmatprep.subr.mxu1 %v201_v11  ;;  %v77_v28 = vld [vmem:[#allocation2] sm:$0xff]  ;;  %v74_v29 = vld [vmem:[%s1020_s0 + $0x8] sm:$0xff]  ;;  %v76_v31 = vld [vmem:[%s1020_s0 + $0x18] sm:$0xff] }
  0x2f   :  { %645 = vmatprep.subr.mxu0 %v87_v8  ;;  %680 = vmatpush3.msra.mxu1 %v201_v11  ;;  %v192_v32 = vld [vmem:[#allocation4 + $0x18] sm:$0xff]  ;;  %v191_v33 = vld [vmem:[#allocation4 + $0x10] sm:$0xff]  ;;  %v190_v34 = vld [vmem:[#allocation4 + $0x8] sm:$0xff] }
  0x30   :  { %646 = vmatpush3.msra.mxu0 %v87_v8  ;;  %681 = vmatprep.subr.mxu1 %v200_v13  ;;  %v189_v35 = vld [vmem:[#allocation4] sm:$0xff]  ;;  %v316_v36 = vld [vmem:[%s1025_s5 + $0x78] sm:$0xff]  ;;  %v315_v37 = vld [vmem:[%s1025_s5 + $0x70] sm:$0xff] }
  0x31   :  { %647 = vmatprep.subr.mxu0 %v86_v10  ;;  %682 = vmatpush3.msra.mxu1 %v200_v13  ;;  %v314_v38 = vld [vmem:[%s1025_s5 + $0x68] sm:$0xff]  ;;  %v313_v39 = vld [vmem:[%s1025_s5 + $0x60] sm:$0xff]  ;;  %v312_v40 = vld [vmem:[%s1025_s5 + $0x58] sm:$0xff] }
  0x32   :  { %648 = vmatpush3.msra.mxu0 %v86_v10  ;;  %683 = vmatprep.subr.mxu1 %v199_v15  ;;  %v311_v41 = vld [vmem:[%s1025_s5 + $0x50] sm:$0xff]  ;;  %v310_v42 = vld [vmem:[%s1025_s5 + $0x48] sm:$0xff]  ;;  %v309_v43 = vld [vmem:[%s1025_s5 + $0x40] sm:$0xff] }
  0x33   :  { %649 = vmatprep.subr.mxu0 %v85_v12  ;;  %684 = vmatpush3.msra.mxu1 %v199_v15  ;;  %v308_v44 = vld [vmem:[%s1025_s5 + $0x38] sm:$0xff]  ;;  %v307_v45 = vld [vmem:[%s1025_s5 + $0x30] sm:$0xff]  ;;  %v306_v46 = vld [vmem:[%s1025_s5 + $0x28] sm:$0xff] }
  0x34   :  { %650 = vmatpush3.msra.mxu0 %v85_v12  ;;  %685 = vmatprep.subr.mxu1 %v198_v17  ;;  %v305_v47 = vld [vmem:[%s1025_s5 + $0x20] sm:$0xff]  ;;  %v304_v61 = vld [vmem:[%s1025_s5 + $0x18] sm:$0xff]  ;;  %v303_v62 = vld [vmem:[%s1025_s5 + $0x10] sm:$0xff] }
  0x35   :  { %651 = vmatprep.subr.mxu0 %v84_v14  ;;  %686 = vmatpush3.msra.mxu1 %v198_v17  ;;  %v551_v48 = vld [vmem:[%s1022_s2] ss:$0 sm:$0xff]  ;;  %v302_v63 = vld [vmem:[%s1025_s5 + $0x8] sm:$0xff]  ;;  %v428_v1 = vld [vmem:[#allocation6 + $0x78] sm:$0xff] }
  0x36   :  { %652 = vmatpush3.msra.mxu0 %v84_v14  ;;  %687 = vmatprep.subr.mxu1 %v197_v19  ;;  %v301_v0 = vld [vmem:[%s1025_s5] sm:$0xff]  ;;  %v427_v2 = vld [vmem:[#allocation6 + $0x70] sm:$0xff]  ;;  %v426_v3 = vld [vmem:[#allocation6 + $0x68] sm:$0xff] }
  0x37   :  { %653 = vmatprep.subr.mxu0 %v83_v16  ;;  %688 = vmatpush3.msra.mxu1 %v197_v19  ;;  %v425_v4 = vld [vmem:[#allocation6 + $0x60] sm:$0xff]  ;;  %v424_v5 = vld [vmem:[#allocation6 + $0x58] sm:$0xff]  ;;  %v423_v6 = vld [vmem:[#allocation6 + $0x50] sm:$0xff] }
  0x38   :  { %654 = vmatpush3.msra.mxu0 %v83_v16  ;;  %689 = vmatprep.subr.mxu1 %v196_v21  ;;  %v422_v7 = vld [vmem:[#allocation6 + $0x48] sm:$0xff]  ;;  %v421_v8 = vld [vmem:[#allocation6 + $0x40] sm:$0xff]  ;;  %v420_v9 = vld [vmem:[#allocation6 + $0x38] sm:$0xff] }
  0x39   :  { %655 = vmatprep.subr.mxu0 %v82_v18  ;;  %690 = vmatpush3.msra.mxu1 %v196_v21  ;;  %v419_v10 = vld [vmem:[#allocation6 + $0x30] sm:$0xff]  ;;  %v418_v11 = vld [vmem:[#allocation6 + $0x28] sm:$0xff]  ;;  %v417_v12 = vld [vmem:[#allocation6 + $0x20] sm:$0xff] }
  0x3a   :  { %656 = vmatpush3.msra.mxu0 %v82_v18  ;;  %691 = vmatprep.subr.mxu1 %v195_v23  ;;  %v552_v13 = vld [vmem:[%s1024_s4] ss:$0 sm:$0xff] }
  0x3b   :  { %657 = vmatprep.subr.mxu0 %v81_v20  ;;  %692 = vmatpush3.msra.mxu1 %v195_v23 }
  0x3c   :  { %658 = vmatpush3.msra.mxu0 %v81_v20  ;;  %693 = vmatprep.subr.mxu1 %v194_v25 }
  0x3d   :  { %659 = vmatprep.subr.mxu0 %v80_v22  ;;  %694 = vmatpush3.msra.mxu1 %v194_v25 }
  0x3e   :  { %660 = vmatpush3.msra.mxu0 %v80_v22  ;;  %695 = vmatprep.subr.mxu1 %v193_v27 }
  0x3f   :  { %661 = vmatprep.subr.mxu0 %v79_v24  ;;  %696 = vmatpush3.msra.mxu1 %v193_v27  ;;  %v415_v27 = vld [vmem:[#allocation6 + $0x10] sm:$0xff] }
  0x40   :  { %662 = vmatpush3.msra.mxu0 %v79_v24  ;;  %697 = vmatprep.subr.mxu1 %v192_v32 }
  0x41   :  { %663 = vmatprep.subr.mxu0 %v78_v26  ;;  %698 = vmatpush3.msra.mxu1 %v192_v32 }
  0x42   :  { %664 = vmatpush3.msra.mxu0 %v78_v26  ;;  %699 = vmatprep.subr.mxu1 %v191_v33  ;;  %v416_v26 = vld [vmem:[#allocation6 + $0x18] sm:$0xff] }
  0x43   :  { %665 = vmatprep.subr.mxu0 %v77_v28  ;;  %700 = vmatpush3.msra.mxu1 %v191_v33 }
  0x44   :  { %666 = vmatpush3.msra.mxu0 %v77_v28  ;;  %701 = vmatprep.subr.mxu1 %v190_v34  ;;  %v414_v28 = vld [vmem:[#allocation6 + $0x8] sm:$0xff] }
  0x45   :  { %668 = vmatmul.mubr.f32.vlgmr.msra.gmra.mxu0 %v74_v29  ;;  %702 = vmatpush3.msra.mxu1 %v190_v34  ;;  %v413_v29 = vld [vmem:[#allocation6] sm:$0xff] }
  0x46   :  { %670 = vmatprep.mubr.f32.mxu0 %v75_v30  ;;  %703 = vmatprep.subr.mxu1 %v189_v35  ;;  %v553_v30 = vld [vmem:[%s1026_s6] ss:$0 sm:$0xff] }
  0x47   :  { %704 = vmatpush3.msra.mxu1 %v189_v35  ;;  %711 = vmatprep.subr.mxu0 %v316_v36 }
  0x48   :  { %712 = vmatpush3.msra.mxu0 %v316_v36  ;;  %749 = vmatprep.subr.mxu1 %v428_v1 }
  0x49   :  { %671 = vmatmul.mubr.f32.gmra.mxu0 %v76_v31  ;;  %713 = vmatprep.subr.mxu0 %v315_v37 }
  0x4a   :  { %714 = vmatpush3.msra.mxu0 %v315_v37 }
  0x4b   :  { %715 = vmatprep.subr.mxu0 %v314_v38 }
  0x4c   :  { %716 = vmatpush3.msra.mxu0 %v314_v38 }
  0x4d   :  { %717 = vmatprep.subr.mxu0 %v313_v39 }
  0x4e   :  { %718 = vmatpush3.msra.mxu0 %v313_v39 }
  0x4f   :  { %719 = vmatprep.subr.mxu0 %v312_v40 }
  0x50   :  { %720 = vmatpush3.msra.mxu0 %v312_v40 }
  0x51   :  { %721 = vmatprep.subr.mxu0 %v311_v41 }
  0x52   :  { %722 = vmatpush3.msra.mxu0 %v311_v41 }
  0x53   :  { %723 = vmatprep.subr.mxu0 %v310_v42 }
  0x54   :  { %724 = vmatpush3.msra.mxu0 %v310_v42 }
  0x55   :  { %725 = vmatprep.subr.mxu0 %v309_v43 }
  0x56   :  { %726 = vmatpush3.msra.mxu0 %v309_v43  ;;  %v554_v43 = vld [vmem:[%s1028_s8] ss:$0 sm:$0xff] }
  0x57   :  { %727 = vmatprep.subr.mxu0 %v308_v44 }
  0x58   :  { %728 = vmatpush3.msra.mxu0 %v308_v44 }
  0x59   :  { %729 = vmatprep.subr.mxu0 %v307_v45 }
  0x5a   :  { %730 = vmatpush3.msra.mxu0 %v307_v45 }
  0x5b   :  { %731 = vmatprep.subr.mxu0 %v306_v46 }
  0x5c   :  { %732 = vmatpush3.msra.mxu0 %v306_v46 }
  0x5d   :  { %733 = vmatprep.subr.mxu0 %v305_v47 }
  0x5e   :  { %734 = vmatpush3.msra.mxu0 %v305_v47 }
  0x5f   :  { %735 = vmatprep.subr.mxu0 %v304_v61 }
  0x60   :  { %736 = vmatpush3.msra.mxu0 %v304_v61 }
  0x61   :  { %737 = vmatprep.subr.mxu0 %v303_v62 }
  0x62   :  { %738 = vmatpush3.msra.mxu0 %v303_v62 }
  0x63   :  { %739 = vmatprep.subr.mxu0 %v302_v63 }
  0x64   :  { %740 = vmatpush3.msra.mxu0 %v302_v63 }
  0x65   :  { %741 = vmatprep.subr.mxu0 %v301_v0 }
  0x66   :  { %742 = vmatpush3.msra.mxu0 %v301_v0 }
 0x105   :  { %v669_v49 = vpop.f32.mrf.mxu0 }
 0x106   :  { %v172_v50 = vadd.f32 %v669_v49, %v551_v48 }
 0x107   :  { %v166_v51 = vpop.f32.mrf.mxu0 }
 0x108   :  { %v167_v52 = vadd.f32 %v551_v48, %v166_v51  ;;  %v186_v55 = vmax.f32 %v172_v50, 0.0 }
 0x109   :  { %v672_v53 = vpop.f32.mrf.mxu0 }
 0x10a   :  { %v185_v54 = vmax.f32 %v167_v52, 0.0  ;;  %v182_v56 = vadd.f32 %v672_v53, %v551_v48 }
 0x10b   :  { %v176_v57 = vpop.f32.mrf.mxu0 }
 0x10c   :  { %v177_v58 = vadd.f32 %v551_v48, %v176_v57  ;;  %705 = vmatprep.mubr.f32.mxu1 %v185_v54  ;;  %v188_v60 = vmax.f32 %v182_v56, 0.0 }
 0x10d   :  { %706 = vmatmul.mubr.f32.vlgmr.msra.gmra.mxu1 %v186_v55 }
 0x10e   :  { %v187_v59 = vmax.f32 %v177_v58, 0.0  ;;  %750 = vmatpush3.msra.mxu1 %v428_v1 }
 0x10f   :  { %751 = vmatprep.subr.mxu1 %v427_v2 }
 0x110   :  { %708 = vmatprep.mubr.f32.mxu1 %v187_v59  ;;  %752 = vmatpush3.msra.mxu1 %v427_v2 }
 0x111   :  { %709 = vmatmul.mubr.f32.gmra.mxu1 %v188_v60  ;;  %753 = vmatprep.subr.mxu1 %v426_v3 }
 0x112   :  { %754 = vmatpush3.msra.mxu1 %v426_v3 }
 0x113   :  { %755 = vmatprep.subr.mxu1 %v425_v4 }
 0x114   :  { %756 = vmatpush3.msra.mxu1 %v425_v4 }
 0x115   :  { %757 = vmatprep.subr.mxu1 %v424_v5 }
 0x116   :  { %758 = vmatpush3.msra.mxu1 %v424_v5 }
 0x117   :  { %759 = vmatprep.subr.mxu1 %v423_v6 }
 0x118   :  { %760 = vmatpush3.msra.mxu1 %v423_v6 }
 0x119   :  { %761 = vmatprep.subr.mxu1 %v422_v7 }
 0x11a   :  { %762 = vmatpush3.msra.mxu1 %v422_v7 }
 0x11b   :  { %763 = vmatprep.subr.mxu1 %v421_v8 }
 0x11c   :  { %764 = vmatpush3.msra.mxu1 %v421_v8 }
 0x11d   :  { %765 = vmatprep.subr.mxu1 %v420_v9 }
 0x11e   :  { %766 = vmatpush3.msra.mxu1 %v420_v9 }
 0x11f   :  { %767 = vmatprep.subr.mxu1 %v419_v10 }
 0x120   :  { %768 = vmatpush3.msra.mxu1 %v419_v10 }
 0x121   :  { %769 = vmatprep.subr.mxu1 %v418_v11 }
 0x122   :  { %770 = vmatpush3.msra.mxu1 %v418_v11 }
 0x123   :  { %771 = vmatprep.subr.mxu1 %v417_v12 }
 0x124   :  { %772 = vmatpush3.msra.mxu1 %v417_v12 }
 0x125   :  { %773 = vmatprep.subr.mxu1 %v416_v26 }
 0x126   :  { %774 = vmatpush3.msra.mxu1 %v416_v26 }
 0x127   :  { %775 = vmatprep.subr.mxu1 %v415_v27 }
 0x128   :  { %776 = vmatpush3.msra.mxu1 %v415_v27 }
 0x129   :  { %777 = vmatprep.subr.mxu1 %v414_v28 }
 0x12a   :  { %778 = vmatpush3.msra.mxu1 %v414_v28 }
 0x12b   :  { %779 = vmatprep.subr.mxu1 %v413_v29 }
 0x12c   :  { %780 = vmatpush3.msra.mxu1 %v413_v29 }
 0x1cd   :  { %v707_v14 = vpop.f32.mrf.mxu1 }
 0x1ce   :  { %v284_v15 = vadd.f32 %v707_v14, %v552_v13 }
 0x1cf   :  { %v278_v16 = vpop.f32.mrf.mxu1 }
 0x1d0   :  { %v279_v17 = vadd.f32 %v552_v13, %v278_v16  ;;  %v298_v20 = vmax.f32 %v284_v15, 0.0 }
 0x1d1   :  { %v710_v18 = vpop.f32.mrf.mxu1 }
 0x1d2   :  { %v297_v19 = vmax.f32 %v279_v17, 0.0  ;;  %v294_v21 = vadd.f32 %v710_v18, %v552_v13 }
 0x1d3   :  { %v288_v22 = vpop.f32.mrf.mxu1 }
 0x1d4   :  { %v289_v23 = vadd.f32 %v552_v13, %v288_v22  ;;  %743 = vmatprep.mubr.f32.mxu0 %v297_v19  ;;  %v300_v25 = vmax.f32 %v294_v21, 0.0 }
 0x1d5   :  { %744 = vmatmul.mubr.f32.vlgmr.msra.gmra.mxu0 %v298_v20 }
 0x1d6   :  { %v299_v24 = vmax.f32 %v289_v23, 0.0 }
 0x1d8   :  { %746 = vmatprep.mubr.f32.mxu0 %v299_v24 }
 0x1d9   :  { %747 = vmatmul.mubr.f32.gmra.mxu0 %v300_v25 }
 0x295   :  { %v745_v31 = vpop.f32.mrf.mxu0 }
 0x296   :  { %v396_v32 = vadd.f32 %v745_v31, %v553_v30 }
 0x297   :  { %v390_v33 = vpop.f32.mrf.mxu0 }
 0x298   :  { %v391_v34 = vadd.f32 %v553_v30, %v390_v33  ;;  %v410_v37 = vmax.f32 %v396_v32, 0.0 }
 0x299   :  { %v748_v35 = vpop.f32.mrf.mxu0 }
 0x29a   :  { %v409_v36 = vmax.f32 %v391_v34, 0.0  ;;  %v406_v38 = vadd.f32 %v748_v35, %v553_v30 }
 0x29b   :  { %v400_v39 = vpop.f32.mrf.mxu0 }
 0x29c   :  { %v401_v40 = vadd.f32 %v553_v30, %v400_v39  ;;  %781 = vmatprep.mubr.f32.mxu1 %v409_v36  ;;  %v412_v42 = vmax.f32 %v406_v38, 0.0 }
 0x29d   :  { %782 = vmatmul.mubr.f32.vlgmr.msra.gmra.mxu1 %v410_v37 }
 0x29e   :  { %v411_v41 = vmax.f32 %v401_v40, 0.0 }
 0x2a0   :  { %784 = vmatprep.mubr.f32.mxu1 %v411_v41 }
 0x2a1   :  { %785 = vmatmul.mubr.f32.gmra.mxu1 %v412_v42 }
 0x35d   :  { %v783_v44 = vpop.f32.mrf.mxu1 }
 0x35e   :  { %v508_v45 = vadd.f32 %v783_v44, %v554_v43 }
 0x35f   :  { %v502_v46 = vpop.f32.mrf.mxu1 }
 0x360   :  { %v522_v47 = vsub.f32 0.0, %v508_v45  ;;  %v503_v48 = vadd.f32 %v554_v43, %v502_v46 }
 0x361   :  { %v786_v49 = vpop.f32.mrf.mxu1 }
 0x362   :  { %v527_v50 = vmul.f32 1.442695, %v522_v47  ;;  %v521_v51 = vsub.f32 0.0, %v503_v48  ;;  %v518_v52 = vadd.f32 %v786_v49, %v554_v43 }
 0x363   :  { %v512_v53 = vpop.f32.mrf.mxu1 }
 0x364   :  { %792 = vpow2.f32 %v527_v50  ;;  %v525_v54 = vmul.f32 1.442695, %v521_v51  ;;  %v524_v55 = vsub.f32 0.0, %v518_v52  ;;  %v513_v56 = vadd.f32 %v554_v43, %v512_v53 }
 0x366   :  { %794 = vpow2.f32 %v525_v54  ;;  %v531_v57 = vmul.f32 1.442695, %v524_v55  ;;  %v523_v58 = vsub.f32 0.0, %v513_v56 }
 0x368   :  { %796 = vpow2.f32 %v531_v57  ;;  %v529_v59 = vmul.f32 1.442695, %v523_v58 }
 0x36a   :  { %798 = vpow2.f32 %v529_v59 }
 0x371   :  { %v793_v60 = vpop.eup %792 }
 0x372   :  { %v534_v61 = vadd.f32 1.0, %v793_v60 }
 0x373   :  { %v795_v62 = vpop.eup %794 }
 0x374   :  { %800 = vrcp.f32 %v534_v61  ;;  %v533_v63 = vadd.f32 1.0, %v795_v62 }
 0x375   :  { %v797_v0 = vpop.eup %796 }
 0x376   :  { %802 = vrcp.f32 %v533_v63  ;;  %v536_v1 = vadd.f32 1.0, %v797_v0 }
 0x377   :  { %v799_v2 = vpop.eup %798 }
 0x378   :  { %804 = vrcp.f32 %v536_v1  ;;  %v535_v3 = vadd.f32 1.0, %v799_v2 }
 0x37a   :  { %806 = vrcp.f32 %v535_v3 }
 0x381   :  { %v801_v4 = vpop.eup %800 }
 0x382   :  { %542 = vst [vmem:[%s1029_s9 + $0x8] sm:$0xff] %v801_v4 }
 0x383   :  { %v803_v5 = vpop.eup %802 }
 0x384   :  { %541 = vst [vmem:[%s1029_s9] sm:$0xff] %v803_v5 }
 0x385   :  { %v805_v6 = vpop.eup %804 }
 0x386   :  { %544 = vst [vmem:[%s1029_s9 + $0x18] sm:$0xff] %v805_v6 }
 0x387   :  { %v807_v7 = vpop.eup %806 }
 0x388   :  { %543 = vst [vmem:[%s1029_s9 + $0x10] sm:$0xff] %v807_v7 }
 0x389   :  { %549 = vsyncpa [#allocation3], 1 }
 0x38a   :  { %550 = vsyncpa [#allocation5], 1 }

</bundles_post_ra>
